<compile_context>
chip_gen: v7x
topology: tpu7x:2x2x1
jax: 0.10.0
libtpu: 0.0.40
codegen_flags: <defaults>
</compile_context>

<pallas_src>
import functools

import jax
import jax.numpy as jnp
from jax.experimental import pallas as pl
from jax.experimental.pallas import tpu as pltpu


# ----------------------------------------------------------------------------
# Pallas kernel: fused 1x1 conv (channel matmul) + bias
# ----------------------------------------------------------------------------
def _conv1x1_kernel(x_ref, w_ref, b_ref, o_ref):
    # x_ref: (Bn, Cin, T)  folded-batch block, spatial tile on lanes
    # w_ref: (Cout, Cin)
    # b_ref: (Cout, 1)
    # o_ref: (Bn, Cout, T)
    w = w_ref[...]
    b = b_ref[...].astype(jnp.float32)
    for i in range(x_ref.shape[0]):          # Bn is small & static -> cheap unroll
        y = jnp.dot(w, x_ref[i], preferred_element_type=jnp.float32)  # MXU, f32 acc
        o_ref[i] = (y + b).astype(o_ref.dtype)                         # fused bias, dense store


# ----------------------------------------------------------------------------
# Tiling: VMEM-budget-driven spatial tile + batch folding
# ----------------------------------------------------------------------------
def _pick_tiling(N, Cin, Cout, HW, in_bytes, out_bytes):
    """Returns (spatial_tile, batch_fold)."""
    budget = 8 * 1024 * 1024       # double-buffered x+out blocks; fits v5e's 16 MiB
                                   # scoped default, well below v7x's 64 MiB physical
    max_lanes = 16 * 1024          # per-step DMA is already multi-MB before this cap
    per_lane = 2 * (Cin * in_bytes + Cout * out_bytes)   # dbl-buffered bytes / lane / batch elem

    tile_cap = max(1, min(HW, max_lanes, budget // per_lane))
    if tile_cap >= HW:
        # Whole spatial extent in a single (always-legal) block; fold batch
        # elements to amortize the fixed per-grid-step overhead.
        tile = HW
        bn = max(1, min(N, 16, budget // max(per_lane * HW, 1)))
        while N % bn:              # keep the batch grid exact
            bn -= 1
        return tile, bn
    # Lane-dense tile (multiple of 128); a ragged last block is handled by cdiv.
    tile = max(128, (tile_cap // 128) * 128)
    return tile, 1


# ----------------------------------------------------------------------------
# Wrapper: outconv forward
# ----------------------------------------------------------------------------
def conv1x1(x_nchw, weight, bias, *, use_pallas=None):
    """outconv forward.

    x_nchw: (N, Cin, H, W); weight: (Cout, Cin, 1, 1); bias: (Cout,).
    Returns (N, Cout, H, W) in the input dtype (f32 accumulation inside).
    """
    N, Cin, H, W = x_nchw.shape
    Cout = weight.shape[0]
    HW = H * W
    out_dtype = x_nchw.dtype
    in_bytes = jnp.dtype(x_nchw.dtype).itemsize
    out_bytes = jnp.dtype(out_dtype).itemsize

    # Weight/bias are tiny; align weight dtype with x so the MXU sees one dtype.
    w2d = weight.reshape(Cout, Cin).astype(x_nchw.dtype)
    b2d = bias.reshape(Cout, 1)

    if use_pallas is None:
        # Tiny problems are pure launch/step overhead in a custom kernel.
        use_pallas = N * HW * (Cin + Cout) >= (1 << 16)
    if not use_pallas:
        y = jnp.einsum("oc,nchw->nohw",
                       w2d.astype(jnp.float32), x_nchw.astype(jnp.float32))
        y = y + bias.astype(jnp.float32).reshape(1, Cout, 1, 1)
        return y.astype(out_dtype)

    x = x_nchw.reshape(N, Cin, HW)            # contiguous reshape, no data movement
    tile, bn = _pick_tiling(N, Cin, Cout, HW, in_bytes, out_bytes)
    num_s = pl.cdiv(HW, tile)
    num_b = pl.cdiv(N, bn)                    # bn divides N -> exact

    cost = pl.CostEstimate(
        flops=2 * N * Cout * Cin * HW,
        transcendentals=0,
        bytes_accessed=(N * Cin * HW * in_bytes + N * Cout * HW * out_bytes
                        + Cout * Cin * in_bytes + Cout * jnp.dtype(bias.dtype).itemsize),
    )

    out = pl.pallas_call(
        _conv1x1_kernel,
        out_shape=jax.ShapeDtypeStruct((N, Cout, HW), out_dtype),
        grid_spec=pltpu.PrefetchScalarGridSpec(
            num_scalar_prefetch=0,
            # Spatial (normally the long axis) first so v7x megacore splits it.
            grid=(num_s, num_b),
            in_specs=[
                pl.BlockSpec((bn, Cin, tile), lambda s, b: (b, 0, s)),
                pl.BlockSpec((Cout, Cin), lambda s, b: (0, 0)),
                pl.BlockSpec((Cout, 1), lambda s, b: (0, 0)),
            ],
            out_specs=pl.BlockSpec((bn, Cout, tile), lambda s, b: (b, 0, s)),
        ),
        compiler_params=pltpu.CompilerParams(
            dimension_semantics=("parallel", "parallel"),
            vmem_limit_bytes=32 * 1024 * 1024),
        cost_estimate=cost,
    )(x, w2d, b2d)

    return out.reshape(N, Cout, H, W)


def init_outconv_params(key, in_ch, out_ch):
    """PyTorch Conv2d default init: kaiming_uniform(a=sqrt(5)) for the weight
    (bound = 1/sqrt(fan_in)) and uniform(-1/sqrt(fan_in), 1/sqrt(fan_in)) bias."""
    kw, kb = jax.random.split(key)
    fan_in = float(in_ch)  # kernel_size = 1
    bound = 1.0 / jnp.sqrt(fan_in)
    weight = jax.random.uniform(kw, (out_ch, in_ch, 1, 1), jnp.float32,
                                minval=-bound, maxval=bound)
    bias = jax.random.uniform(kb, (out_ch,), jnp.float32,
                              minval=-bound, maxval=bound)
    return weight, bias


if __name__ == "__main__":
    # outconv(in_ch=4, out_ch=8) on a (2, 4, 16, 16) NCHW input.
    in_ch, out_ch = 4, 8
    N, H, W = 2, 4 * 0 + 16, 16

    key = jax.random.PRNGKey(0)
    k_p, k_x = jax.random.split(key)
    weight, bias = init_outconv_params(k_p, in_ch, out_ch)
    x = jax.random.normal(k_x, (N, in_ch, H, W), jnp.float32)

    # Force the Pallas path so the kernel itself is exercised (the auto
    # dispatcher would route this toy shape to the plain-XLA fast path).
    fwd = jax.jit(functools.partial(conv1x1, use_pallas=True))
    out = jax.block_until_ready(fwd(x, weight, bias))
    assert out.shape == (N, out_ch, H, W), out.shape
    assert out.dtype == x.dtype, out.dtype

    # Reference check against a plain-JAX 1x1 conv.
    ref = jnp.einsum("oc,nchw->nohw", weight.reshape(out_ch, in_ch), x)
    ref = ref + bias[None, :, None, None]
    assert jnp.allclose(out, ref, atol=1e-4, rtol=1e-4)

    print("KERNEL_OK")
</pallas_src>

<mosaic_0001>
module attributes {stable_mosaic.version = 11 : i64} {
  func.func @_conv1x1_kernel(%arg0: i32, %arg1: i32, %arg2: memref<2x4x256xf32, #tpu.memory_space<vmem>>, %arg3: memref<8x4xf32, #tpu.memory_space<vmem>>, %arg4: memref<8x1xf32, #tpu.memory_space<vmem>>, %arg5: memref<2x8x256xf32, #tpu.memory_space<vmem>>) attributes {dimension_semantics = [#tpu.dimension_semantics<parallel>, #tpu.dimension_semantics<parallel>], iteration_bounds = array<i64: 1, 1>, scalar_prefetch = 0 : i64, scratch_operands = 0 : i64, tpu.core_type = #tpu.core_type<tc>, window_params = [{transform_indices = @transform_0, window_bounds = array<i64: 2, 4, 256>}, {pipeline_mode = #tpu.pipeline_mode<synchronous>, transform_indices = @transform_1, window_bounds = array<i64: 8, 4>}, {pipeline_mode = #tpu.pipeline_mode<synchronous>, transform_indices = @transform_2, window_bounds = array<i64: 8, 1>}, {transform_indices = @transform_3, window_bounds = array<i64: 2, 8, 256>}]} {
    %c0 = arith.constant 0 : index
    %c0_0 = arith.constant 0 : index
    %0 = vector.load %arg3[%c0, %c0_0] : memref<8x4xf32, #tpu.memory_space<vmem>>, vector<8x4xf32>
    %c0_1 = arith.constant 0 : index
    %c0_2 = arith.constant 0 : index
    %1 = vector.load %arg4[%c0_1, %c0_2] : memref<8x1xf32, #tpu.memory_space<vmem>>, vector<8x1xf32>
    %c0_3 = arith.constant 0 : index
    %c0_4 = arith.constant 0 : index
    %c0_5 = arith.constant 0 : index
    %2 = vector.load %arg2[%c0_3, %c0_4, %c0_5] : memref<2x4x256xf32, #tpu.memory_space<vmem>>, vector<1x4x256xf32>
    %3 = vector.shape_cast %2 : vector<1x4x256xf32> to vector<4x256xf32>
    %cst = arith.constant dense<0.000000e+00> : vector<8x256xf32>
    %4 = tpu.matmul %0, %3, %cst {dimension_numbers = #tpu.dot_dimension_numbers<[1], [0], [0], [1], [0, 0, 1, 1], [], []>} : vector<8x4xf32>, vector<4x256xf32>, vector<8x256xf32> -> vector<8x256xf32>
    %5 = vector.broadcast %1 : vector<8x1xf32> to vector<8x256xf32>
    %6 = arith.addf %4, %5 : vector<8x256xf32>
    %c0_6 = arith.constant 0 : index
    %c0_7 = arith.constant 0 : index
    %c0_8 = arith.constant 0 : index
    %7 = vector.load %arg5[%c0_6, %c0_7, %c0_8] : memref<2x8x256xf32, #tpu.memory_space<vmem>>, vector<1x8x256xf32>
    %8 = vector.shape_cast %7 : vector<1x8x256xf32> to vector<8x256xf32>
    %9 = vector.shape_cast %6 : vector<8x256xf32> to vector<1x8x256xf32>
    tpu.vector_store %arg5[%c0_6, %c0_7, %c0_8], %9 {strides = array<i32>} : memref<2x8x256xf32, #tpu.memory_space<vmem>>, vector<1x8x256xf32>,
    %c1 = arith.constant 1 : index
    %c0_9 = arith.constant 0 : index
    %c0_10 = arith.constant 0 : index
    %10 = vector.load %arg2[%c1, %c0_9, %c0_10] : memref<2x4x256xf32, #tpu.memory_space<vmem>>, vector<1x4x256xf32>
    %11 = vector.shape_cast %10 : vector<1x4x256xf32> to vector<4x256xf32>
    %cst_11 = arith.constant dense<0.000000e+00> : vector<8x256xf32>
    %12 = tpu.matmul %0, %11, %cst_11 {dimension_numbers = #tpu.dot_dimension_numbers<[1], [0], [0], [1], [0, 0, 1, 1], [], []>} : vector<8x4xf32>, vector<4x256xf32>, vector<8x256xf32> -> vector<8x256xf32>
    %13 = vector.broadcast %1 : vector<8x1xf32> to vector<8x256xf32>
    %14 = arith.addf %12, %13 : vector<8x256xf32>
    %c1_12 = arith.constant 1 : index
    %c0_13 = arith.constant 0 : index
    %c0_14 = arith.constant 0 : index
    %15 = vector.load %arg5[%c1_12, %c0_13, %c0_14] : memref<2x8x256xf32, #tpu.memory_space<vmem>>, vector<1x8x256xf32>
    %16 = vector.shape_cast %15 : vector<1x8x256xf32> to vector<8x256xf32>
    %17 = vector.shape_cast %14 : vector<8x256xf32> to vector<1x8x256xf32>
    tpu.vector_store %arg5[%c1_12, %c0_13, %c0_14], %17 {strides = array<i32>} : memref<2x8x256xf32, #tpu.memory_space<vmem>>, vector<1x8x256xf32>,
    return
  }
  func.func @transform_0(%arg0: i32, %arg1: i32) -> (i32, i32, i32) {
    %c0_i32 = arith.constant 0 : i32
    %c0_i32_0 = arith.constant 0 : i32
    return %arg1, %c0_i32, %arg0 : i32, i32, i32
  }
  func.func @transform_1(%arg0: i32, %arg1: i32) -> (i32, i32) {
    %c0_i32 = arith.constant 0 : i32
    %c0_i32_0 = arith.constant 0 : i32
    %c0_i32_1 = arith.constant 0 : i32
    return %c0_i32, %c0_i32_0 : i32, i32
  }
  func.func @transform_2(%arg0: i32, %arg1: i32) -> (i32, i32) {
    %c0_i32 = arith.constant 0 : i32
    %c0_i32_0 = arith.constant 0 : i32
    %c0_i32_1 = arith.constant 0 : i32
    return %c0_i32, %c0_i32_0 : i32, i32
  }
  func.func @transform_3(%arg0: i32, %arg1: i32) -> (i32, i32, i32) {
    %c0_i32 = arith.constant 0 : i32
    %c0_i32_0 = arith.constant 0 : i32
    return %arg1, %c0_i32, %arg0 : i32, i32, i32
  }
}

</mosaic_0001>

<bundles_post_ra>
// kernel: conv1x1.1
= control target key start
LH: loop header
LB: loop body
LE: loop exit
PB: predicated region body
PF: predicated region fallthrough
CT: control target
= control target key end

     0   :  { %vm28_vm0 = vcmask 1043456   ;;  %v206_v2 = vmov 0.0   ;;  %v207_v5 = vmov 0   ;;  %vm24_vm1 = vcmask 31744   ;;  %s256_s0 = inlined_call_operand.vmem [shape: f32[2,4,256], index: 0, kind: input, shape index: {}]   ;;  %s257_s1 = inlined_call_operand.vmem [shape: f32[8,4], index: 1, kind: input, shape index: {}]   ;;  %s258_s2 = inlined_call_operand.vmem [shape: f32[8,1], index: 2, kind: input, shape index: {}]   ;;  %s259_s3 = inlined_call_operand.vmem [shape: f32[2,8,256], index: 3, kind: output, shape index: {}]  }
   0x1   :  { %v16_v0 = vld [vmem:[%s256_s0] sm:$0xff]  ;;  %v195_v1 = vld [vmem:[%s256_s0 + $0x8] sm:$0xff]  ;;  %97 = vmatprep.mubr.f32.mxu0 %v206_v2  ;;  %178 = vmatprep.mubr.f32.mxu1 %v206_v2 }
   0x2   :  { %v23_v3 = vcombine.high %v16_v0, %v16_v0  ;;  %v109_v4 = vcombine.high %v195_v1, %v195_v1  ;;  %203 = vset.pattern.permute.xlu0 %v207_v5  ;;  %v15_v6 = vld [vmem:[%s258_s2] sm:$0xff] }
   0x3   :  { %v14_v7 = vld [vmem:[%s257_s1] sm:$0xff]  ;;  %19 = vperm.xlu0 %203, %v15_v6  }
   0x4   :  { %192 = vmatprep.subr.msk.mxu0 %vm28_vm0, %v23_v3  ;;  %196 = vmatprep.subr.msk.mxu1 %vm28_vm0, %v109_v4 }
   0x5   :  { %193 = vmatpush1.msk.msra.mxu0 %vm28_vm0, %v16_v0  ;;  %197 = vmatpush1.msk.msra.mxu1 %vm28_vm0, %v195_v1 }
   0x6   :  { %194 = vmatmul.mubr.msk.f32.vlgmr.msra.gmra.mrb[0].mxu0 %vm24_vm1, %v14_v7  ;;  %198 = vmatmul.mubr.msk.f32.vlgmr.msra.gmra.mrb[0].mxu1 %vm24_vm1, %v14_v7 }
  0x82   :  { %v20_v8 = vpop.permute.xlu0 %19 }
  0xd9   :  { %v99_v9 = vpop.f32.mrb[0].mxu0  ;;  %v180_v10 = vpop.f32.mrb[0].mxu1 }
  0xda   :  { %v100_v11 = vadd.f32 %v99_v9, %v20_v8  ;;  %v181_v12 = vadd.f32 %v180_v10, %v20_v8  ;;  %v101_v13 = vpop.f32.mrb[1].mxu0  ;;  %v182_v14 = vpop.f32.mrb[1].mxu1 }
  0xdb   :  { %v102_v15 = vadd.f32 %v101_v13, %v20_v8  ;;  %v183_v16 = vadd.f32 %v182_v14, %v20_v8 }
  0xdc   :  { %104 = vst [vmem:[%s259_s3] sm:$0xff] %v100_v11  ;;  %199 = vst [vmem:[%s259_s3 + $0x10] sm:$0xff] %v181_v12 }
  0xdd   :  { %105 = vst [vmem:[%s259_s3 + $0x8] sm:$0xff] %v102_v15  ;;  %200 = vst [vmem:[%s259_s3 + $0x18] sm:$0xff] %v183_v16 }

</bundles_post_ra>
